<compile_context>
chip_gen: v7x
topology: tpu7x:2x2x1
jax: 0.10.0
libtpu: 0.0.40
codegen_flags: <defaults>
</compile_context>

<pallas_src>
import functools
import math

import jax
import jax.numpy as jnp
from jax.experimental import pallas as pl
from jax.experimental.pallas import tpu as pltpu


_TARGET_BLOCK_BYTES = 4 << 20   # ~4 MiB x-block: measured ~85% of HBM roofline for f32 adds
_MIN_SPLIT_BYTES = 1 << 20      # only force >=2 grid steps (v7x megacore) if halves stay >= 1 MiB
_VMEM_LIMIT_BYTES = 48 << 20    # raises v5e/v6e default scoped limits, fits v7x's 64 MiB physical


def _posenc_kernel_3d(x_ref, pe_ref, o_ref, *, scale):
    """x_ref/o_ref: (TS, B, D); pe_ref: (TS, D), broadcast over batch in-kernel."""
    x = x_ref[...]
    if scale is not None:
        x = x * scale
    o_ref[...] = (x + pe_ref[...][:, None, :]).astype(o_ref.dtype)


def _posenc_kernel_2d(x_ref, pe_ref, o_ref, *, scale):
    """x_ref/pe_ref/o_ref: (TS, B*D) lane-dense."""
    x = x_ref[...]
    if scale is not None:
        x = x * scale
    o_ref[...] = (x + pe_ref[...]).astype(o_ref.dtype)


def make_positional_encoding_buffer(d_model: int, max_len: int = 5000,
                                    dtype=jnp.float32) -> jax.Array:
    """Builds the (max_len, 1, d_model) pe buffer exactly like the PyTorch __init__."""
    # Same limitation as the torch impl, made explicit: interleaved sin/cos needs even D.
    assert d_model % 2 == 0, "PositionalEncoding requires an even d_model"
    position = jnp.arange(max_len, dtype=jnp.float32)[:, None]                      # (L, 1)
    div_term = jnp.exp(jnp.arange(0, d_model, 2, dtype=jnp.float32)
                       * (-math.log(10000.0) / d_model))                            # (D/2,)
    angles = position * div_term                                                    # (L, D/2)
    pe = jnp.zeros((max_len, d_model), dtype=jnp.float32)
    pe = pe.at[:, 0::2].set(jnp.sin(angles))
    pe = pe.at[:, 1::2].set(jnp.cos(angles))
    # pe.unsqueeze(0).transpose(0, 1) -> (max_len, 1, d_model)
    return pe.astype(dtype)[:, None, :]


def positional_encoding(x: jax.Array, pe: jax.Array, *,
                        seq_tile: int | None = None,
                        scale: float | None = None) -> jax.Array:
    """Forward pass: x (S, B, D) + pe[:S], broadcast over batch, one fused Pallas kernel.

    scale=None reproduces the torch module exactly; a float fuses x*scale + pe[:S].
    pe may be the torch-style (max_len, 1, D) buffer or a 2D (max_len, D) table.
    """
    S, B, D = x.shape
    pe2d = pe.reshape(pe.shape[0], pe.shape[-1]) if pe.ndim == 3 else pe
    L, Dp = pe2d.shape
    if Dp != D or S > L:
        raise ValueError("pe buffer incompatible with input")

    itemsize = jnp.dtype(x.dtype).itemsize
    sublane = max(8, 32 // itemsize)           # 8 rows f32, 16 bf16, 32 int8
    row_bytes = B * D * itemsize               # bytes of x per seq row

    # Prefer the 3D layout when its blocks are already sublane/lane dense (keeps pe HBM
    # traffic at x/B); otherwise fall back to a lane-dense flattened 2D layout.
    dense_3d = (D % 128 == 0) and (B % sublane == 0)

    if seq_tile is None:
        # Byte-based sizing: largest seq tile whose x block stays near the 4 MiB target.
        seq_tile = max(1, _TARGET_BLOCK_BYTES // max(row_bytes, 1))
        seq_tile = min(seq_tile, S)
        # Give the ("parallel",) seq axis at least 2 steps (v7x has 2 TensorCores) as long
        # as each half still amortises the ~0.35us/step overhead; harmless on v5e/v6e.
        if seq_tile == S and S > 1 and (S // 2) * row_bytes >= _MIN_SPLIT_BYTES:
            seq_tile = pl.cdiv(S, 2)
        if not dense_3d and seq_tile < S:
            # 2D layout puts seq on the sublane axis: keep partial blocks 8/16/32-aligned.
            seq_tile = max(sublane, (seq_tile // sublane) * sublane)
    seq_tile = min(seq_tile, S)
    grid = (pl.cdiv(S, seq_tile),)

    # Only the first S rows of pe are ever needed; a partial last block may read a few
    # padded rows past S, but those outputs are masked on store and never reach HBM.
    pe_used = pe2d[:S]

    compiler_params = pltpu.CompilerParams(
        dimension_semantics=("parallel",),            # independent seq tiles -> megacore
        vmem_limit_bytes=_VMEM_LIMIT_BYTES,
    )

    if dense_3d:
        kernel = functools.partial(_posenc_kernel_3d, scale=scale)
        return pl.pallas_call(
            kernel,
            out_shape=jax.ShapeDtypeStruct((S, B, D), x.dtype),
            grid=grid,
            in_specs=[
                pl.BlockSpec((seq_tile, B, D), lambda i: (i, 0, 0)),   # x tile
                pl.BlockSpec((seq_tile, D), lambda i: (i, 0)),         # pe tile (2D, no pad)
            ],
            out_specs=pl.BlockSpec((seq_tile, B, D), lambda i: (i, 0, 0)),
            compiler_params=compiler_params,
        )(x, pe_used)

    # Lane-dense fallback: (S, B*D).  x.reshape is a free view for contiguous (S, B, D);
    # pe is pre-broadcast (extra pe reads, but unmasked/unpadded stores on the big arrays).
    kernel = functools.partial(_posenc_kernel_2d, scale=scale)
    x_flat = x.reshape(S, B * D)
    pe_flat = jnp.broadcast_to(pe_used[:, None, :], (S, B, D)).reshape(S, B * D)
    out_flat = pl.pallas_call(
        kernel,
        out_shape=jax.ShapeDtypeStruct((S, B * D), x.dtype),
        grid=grid,
        in_specs=[
            pl.BlockSpec((seq_tile, B * D), lambda i: (i, 0)),
            pl.BlockSpec((seq_tile, B * D), lambda i: (i, 0)),
        ],
        out_specs=pl.BlockSpec((seq_tile, B * D), lambda i: (i, 0)),
        compiler_params=compiler_params,
    )(x_flat, pe_flat)
    return out_flat.reshape(S, B, D)


if __name__ == "__main__":
    key = jax.random.PRNGKey(0)

    # Case 1: the module's small "awkward" shape (batch=2, d_model=32) -> lane-dense 2D path.
    S1, B1, D1 = 16, 2, 32
    pe1 = make_positional_encoding_buffer(D1, max_len=64)
    x1 = jax.random.normal(key, (S1, B1, D1), dtype=jnp.float32)
    out1 = jax.block_until_ready(positional_encoding(x1, pe1))
    ref1 = x1 + pe1[:S1]                       # pe (L,1,D) broadcasts over batch
    assert out1.shape == (S1, B1, D1)
    assert jnp.allclose(out1, ref1, atol=1e-6, rtol=1e-6)

    # Case 2: hardware-friendly shape (batch=8, d_model=128) -> dense 3D path (pe traffic
    # = x/B), with an explicit seq_tile that does NOT divide S to exercise the masked
    # partial last block.
    S2, B2, D2 = 24, 8, 128
    pe2 = make_positional_encoding_buffer(D2, max_len=64)
    x2 = jax.random.normal(jax.random.PRNGKey(0), (S2, B2, D2), dtype=jnp.float32)
    out2 = jax.block_until_ready(positional_encoding(x2, pe2, seq_tile=16))
    ref2 = x2 + pe2[:S2]
    assert out2.shape == (S2, B2, D2)
    assert jnp.allclose(out2, ref2, atol=1e-6, rtol=1e-6)

    print("KERNEL_OK")
</pallas_src>

<mosaic_0001>
module attributes {stable_mosaic.version = 11 : i64} {
  func.func @_posenc_kernel_2d(%arg0: i32, %arg1: memref<16x64xf32, #tpu.memory_space<vmem>>, %arg2: memref<16x64xf32, #tpu.memory_space<vmem>>, %arg3: memref<16x64xf32, #tpu.memory_space<vmem>>) attributes {dimension_semantics = [#tpu.dimension_semantics<parallel>], iteration_bounds = array<i64: 1>, scalar_prefetch = 0 : i64, scratch_operands = 0 : i64, tpu.core_type = #tpu.core_type<tc>, window_params = [{transform_indices = @transform_0, window_bounds = array<i64: 16, 64>}, {transform_indices = @transform_1, window_bounds = array<i64: 16, 64>}, {transform_indices = @transform_2, window_bounds = array<i64: 16, 64>}]} {
    %c0 = arith.constant 0 : index
    %c0_0 = arith.constant 0 : index
    %0 = vector.load %arg1[%c0, %c0_0] : memref<16x64xf32, #tpu.memory_space<vmem>>, vector<16x64xf32>
    %c0_1 = arith.constant 0 : index
    %c0_2 = arith.constant 0 : index
    %1 = vector.load %arg2[%c0_1, %c0_2] : memref<16x64xf32, #tpu.memory_space<vmem>>, vector<16x64xf32>
    %2 = arith.addf %0, %1 : vector<16x64xf32>
    %c0_3 = arith.constant 0 : index
    %c0_4 = arith.constant 0 : index
    %3 = vector.load %arg3[%c0_3, %c0_4] : memref<16x64xf32, #tpu.memory_space<vmem>>, vector<16x64xf32>
    tpu.vector_store %arg3[%c0_3, %c0_4], %2 {strides = array<i32>} : memref<16x64xf32, #tpu.memory_space<vmem>>, vector<16x64xf32>,
    return
  }
  func.func @transform_0(%arg0: i32) -> (i32, i32) {
    %c0_i32 = arith.constant 0 : i32
    %c0_i32_0 = arith.constant 0 : i32
    return %arg0, %c0_i32 : i32, i32
  }
  func.func @transform_1(%arg0: i32) -> (i32, i32) {
    %c0_i32 = arith.constant 0 : i32
    %c0_i32_0 = arith.constant 0 : i32
    return %arg0, %c0_i32 : i32, i32
  }
  func.func @transform_2(%arg0: i32) -> (i32, i32) {
    %c0_i32 = arith.constant 0 : i32
    %c0_i32_0 = arith.constant 0 : i32
    return %arg0, %c0_i32 : i32, i32
  }
}

</mosaic_0001>

<bundles_post_ra>
// kernel: tpu_custom_call.1
= control target key start
LH: loop header
LB: loop body
LE: loop exit
PB: predicated region body
PF: predicated region fallthrough
CT: control target
= control target key end

     0   :  { %7 = vsyncpa [#allocation3], 0  ;;  %s209_s0 = inlined_call_operand.hbm [shape: f32[16,64], index: 0, kind: input, shape index: {}]   ;;  %s210_s1 = inlined_call_operand.hbm [shape: f32[16,64], index: 1, kind: input, shape index: {}]   ;;  %s211_s2 = inlined_call_operand.hbm [shape: f32[16,64], index: 2, kind: output, shape index: {}]  }
   0x1   :  { %8 = vsyncpa [#allocation6], 0 }
   0x2   :  { %9 = vsyncpa [#allocation4], 0  ;;  %s144_s9 = smov [#allocation2]   ;;  %s72_s13 = scalar_lea.hbm %s209_s0, 256 }
   0x3   :  { %s15_s10 = sshll.u32 %s144_s9, 4  ;;  %p73_p0 = scmp.ne.s32.totalorder %s209_s0, %s72_s13  ;;  %s16_s10 = int_to_ptr.vmem [resolvable:$true] %s15_s10 }
   0x4   :  { %p76_p1 = scmp.lt.u32.totalorder %s72_s13, %s209_s0 }
   0x6   :  { %p78_p2 = pnand %p76_p1, %p73_p0 }
   0x8   :  { %81 = shalt.err (!%p78_p2)
}
   0x9   :  { %s82_s18 = scalar_lea.vmem %s16_s10, 256  ;;  %p87_p4 = scmp.lt.s32.totalorder %s16_s10, %s16_s10 }
   0xa   :  { %p83_p3 = scmp.ne.s32.totalorder %s16_s10, %s82_s18  ;;  %p88_p5 = scmp.lt.s32.totalorder %s82_s18, %s82_s18 }
   0xc   :  { %p89_p6 = por %p88_p5, %p87_p4 }
   0xe   :  { %p90_p7 = pnand %p89_p6, %p83_p3 }
  0x10   :  { %93 = shalt.err (!%p90_p7)
}
  0x11   :  { %s145_s19 = smov 128   ;;  %s146_s20 = smov 8  }
  0x12   :  { %21 = dma.hbm_to_vmem [thread:$0]  %s209_s0, 256, %s16_s10, [#allocation3], %s145_s19, %s145_s19, %s146_s20  }
  0x13   :  { %s147_s23 = smov [#allocation5]   ;;  %s94_s27 = scalar_lea.hbm %s210_s1, 256 }
  0x14   :  { %s27_s24 = sshll.u32 %s147_s23, 4  ;;  %p95_p8 = scmp.ne.s32.totalorder %s210_s1, %s94_s27  ;;  %s28_s24 = int_to_ptr.vmem [resolvable:$true] %s27_s24 }
  0x15   :  { %p98_p9 = scmp.lt.u32.totalorder %s94_s27, %s210_s1 }
  0x17   :  { %p100_p10 = pnand %p98_p9, %p95_p8 }
  0x19   :  { %103 = shalt.err (!%p100_p10)
}
  0x1a   :  { %s104_s4 = scalar_lea.vmem %s28_s24, 256  ;;  %p109_p12 = scmp.lt.s32.totalorder %s28_s24, %s28_s24 }
  0x1b   :  { %p105_p11 = scmp.ne.s32.totalorder %s28_s24, %s104_s4  ;;  %p110_p13 = scmp.lt.s32.totalorder %s104_s4, %s104_s4 }
  0x1d   :  { %p111_p0 = por %p110_p13, %p109_p12 }
  0x1f   :  { %p112_p1 = pnand %p111_p0, %p105_p11 }
  0x21   :  { %115 = shalt.err (!%p112_p1)
}
  0x22   :  { %33 = dma.hbm_to_vmem [thread:$0]  %s210_s1, 256, %s28_s24, [#allocation6], %s145_s19, %s145_s19, %s146_s20  }
  0x23   :  { %138 = dma.done.wait [#allocation3], 256  }
  0x24   :  { %139 = vsyncadd [#allocation3], 4294967040 }
  0x25   :  { %140 = dma.done.wait [#allocation6], 256  }
  0x26   :  { %141 = vsyncadd [#allocation6], 4294967040  ;;  %s148_s6 = smov [#allocation7]   ;;  %v40_v0 = vld [vmem:[#allocation2] sm:$0xff]  ;;  %v42_v1 = vld [vmem:[#allocation5] sm:$0xff]  ;;  %vm46_vm0 = vcmask 523264  }
  0x27   :  { %s54_s7 = sshll.u32 %s148_s6, 4  ;;  %v41_v2 = vld [vmem:[#allocation2 + $0x8] sm:$0xff]  ;;  %v44_v3 = vadd.f32 %v42_v1, %v40_v0  ;;  %v43_v4 = vld [vmem:[#allocation5 + $0x8] sm:$0xff]  ;;  %s55_s7 = int_to_ptr.vmem [resolvable:$true] %s54_s7 }
  0x28   :  { %v45_v5 = vadd.f32 %v43_v4, %v41_v2  ;;  %s116_s8 = scalar_lea.vmem %s55_s7, 256  ;;  %p121_p3 = scmp.lt.s32.totalorder %s55_s7, %s55_s7 }
  0x29   :  { %47 = vst.msk [vmem:[#allocation7] sm:$0xff] %vm46_vm0, %v44_v3  ;;  %p117_p2 = scmp.ne.s32.totalorder %s55_s7, %s116_s8  ;;  %p122_p4 = scmp.lt.s32.totalorder %s116_s8, %s116_s8 }
  0x2a   :  { %48 = vst.msk [vmem:[#allocation7 + $0x8] sm:$0xff] %vm46_vm0, %v45_v5 }
  0x2b   :  { %p123_p5 = por %p122_p4, %p121_p3 }
  0x2d   :  { %p124_p6 = pnand %p123_p5, %p117_p2 }
  0x2f   :  { %127 = shalt.err (!%p124_p6)
}
  0x30   :  { %s128_s10 = scalar_lea.hbm %s211_s2, 256 }
  0x31   :  { %p129_p7 = scmp.ne.s32.totalorder %s211_s2, %s128_s10  ;;  %p132_p8 = scmp.lt.u32.totalorder %s128_s10, %s211_s2 }
  0x33   :  { %p134_p9 = pnand %p132_p8, %p129_p7 }
  0x35   :  { %137 = shalt.err (!%p134_p9)
}
  0x36   :  { %60 = dma.vmem_to_hbm [thread:$0]  %s55_s7, 256, %s211_s2, [#allocation4], %s145_s19, %s145_s19, %s146_s20  }
  0x37   :  { %142 = dma.done.wait [#allocation4], 256  }
  0x38   :  { %143 = vsyncadd [#allocation4], 4294967040 }
  0x39   :  { %64 = vsyncpa [#allocation3], 1 }
  0x3a   :  { %65 = vsyncpa [#allocation6], 1 }
  0x3b   :  { %66 = vsyncpa [#allocation4], 1 }

</bundles_post_ra>
